<compile_context>
chip_gen: v5e
topology: v5e:2x2
jax: 0.10.0
libtpu: 0.0.40
codegen_flags: <defaults>
</compile_context>

<pallas_src>
import functools
from math import sqrt

import jax
import jax.numpy as jnp
from jax import lax
from jax.experimental import pallas as pl
from jax.experimental.pallas import tpu as pltpu


# ----------------------------------------------------------------------------
# Kernel bodies
# ----------------------------------------------------------------------------
def _attention_body(q_ref, k_ref, v_ref, mask_ref, o_ref,
                    q_sc, m_sc, l_sc, acc_sc,
                    *, scale, dot_dtype, mask_slices):
    # q_ref: (G, Lt, E), k_ref: (G, St, E), v_ref: (G, St, D), o_ref: (G, Lt, D)
    # mask_ref: None | streamed tile | resident full (1, mL, mS)
    # scratch: q_sc (G, Lt, E) dot dtype; m_sc/l_sc (G, Lt, 1) f32; acc_sc (G, Lt, D) f32
    si = pl.program_id(2)

    @pl.when(si == 0)
    def _():
        # q block is resident across si: fold the softmax scale in ONCE per tile.
        q_sc[...] = (q_ref[...] * scale).astype(q_sc.dtype)
        m_sc[...] = jnp.full(m_sc.shape, -jnp.inf, m_sc.dtype)
        l_sc[...] = jnp.zeros(l_sc.shape, l_sc.dtype)
        acc_sc[...] = jnp.zeros(acc_sc.shape, acc_sc.dtype)

    q = q_sc[...]                               # pre-scaled, dot dtype
    k = k_ref[...].astype(dot_dtype)
    v = v_ref[...].astype(dot_dtype)

    # scores[g, l, s] = sum_e q[g, l, e] * k[g, s, e]   (no explicit k.T)
    s = lax.dot_general(q, k, (((2,), (2,)), ((0,), (0,))),
                        preferred_element_type=jnp.float32)   # (G, Lt, St) f32

    m_prev = m_sc[...]
    m_new = jnp.maximum(m_prev, jnp.max(s, axis=-1, keepdims=True))
    alpha = jnp.exp(m_prev - m_new)
    p = jnp.exp(s - m_new)                      # UNMASKED probabilities (f32)

    # Denominator from UNMASKED probabilities (mask-after-softmax semantics).
    l_sc[...] = alpha * l_sc[...] + jnp.sum(p, axis=-1, keepdims=True)

    if mask_ref is not None:
        if mask_slices is None:
            m = mask_ref[...]                   # streamed tile (BlockSpec-shaped)
        else:
            # VMEM-resident broadcast mask: slice the tile in-kernel.
            lt, st = mask_slices
            li = pl.program_id(1)
            rows = pl.ds(pl.multiple_of(li * lt, lt), lt) if lt else slice(None)
            cols = pl.ds(pl.multiple_of(si * st, st), st) if st else slice(None)
            m = mask_ref[:, rows, cols]
        p = p * m.astype(jnp.float32)           # int8 / bool / float masks alike

    pv = lax.dot_general(p.astype(dot_dtype), v, (((2,), (1,)), ((0,), (0,))),
                         preferred_element_type=jnp.float32)   # (G, Lt, D) f32
    acc_sc[...] = alpha * acc_sc[...] + pv
    m_sc[...] = m_new

    @pl.when(si == pl.num_programs(2) - 1)
    def _():
        # Approx (EUP) reciprocal only when the output dtype can't see the error.
        approx = jnp.dtype(o_ref.dtype).itemsize < 4
        inv_l = pl.reciprocal(l_sc[...], approx=approx)
        o_ref[...] = (acc_sc[...] * inv_l).astype(o_ref.dtype)


def _attn_kernel(q_ref, k_ref, v_ref, o_ref, q_sc, m_sc, l_sc, acc_sc,
                 *, scale, dot_dtype):
    _attention_body(q_ref, k_ref, v_ref, None, o_ref, q_sc, m_sc, l_sc, acc_sc,
                    scale=scale, dot_dtype=dot_dtype, mask_slices=None)


def _masked_attn_kernel(q_ref, k_ref, v_ref, mask_ref, o_ref,
                        q_sc, m_sc, l_sc, acc_sc,
                        *, scale, dot_dtype, mask_slices):
    _attention_body(q_ref, k_ref, v_ref, mask_ref, o_ref, q_sc, m_sc, l_sc, acc_sc,
                    scale=scale, dot_dtype=dot_dtype, mask_slices=mask_slices)


# ----------------------------------------------------------------------------
# VMEM accounting / tiling heuristics
# ----------------------------------------------------------------------------
_FALLBACK_VMEM = 64 * 1024 * 1024   # v7x per-TensorCore physical (conservative)


def _round_up(n, m):
    return -(-n // m) * m


def _lane_pad(n):
    return _round_up(max(int(n), 1), 128)


def _sublane_pad(n, itemsize):
    mult = {4: 8, 2: 16, 1: 32}.get(int(itemsize), 8)
    return _round_up(max(int(n), 1), mult)


def _tile_bytes(sub, lane, itemsize):
    """Padded VMEM footprint of a (sub, lane) tile of `itemsize`-byte elements."""
    return _sublane_pad(sub, itemsize) * _lane_pad(lane) * int(itemsize)


def _vmem_caps():
    """(vmem_limit_bytes to request, byte budget our own tile set may use)."""
    try:
        cap = int(pltpu.get_tpu_info().vmem_capacity_bytes)
    except Exception:
        cap = _FALLBACK_VMEM
    limit = min(int(cap * 0.85), 112 * 1024 * 1024)   # leave compiler headroom
    budget = min(int(cap * 0.65), 96 * 1024 * 1024)   # ~41 MiB v7x, ~83 MiB v5e/v6e
    return limit, budget


def _pick_tile(dim, candidates):
    """Largest candidate that evenly divides dim (>=, so exact-power dims keep
    full-size tiles), else the full dim (full dims are always legal blocks)."""
    for c in candidates:
        if dim >= c and dim % c == 0:
            return c
    return dim


# ----------------------------------------------------------------------------
# Wrapper
# ----------------------------------------------------------------------------
def mask_attention(queries, keys, values, mask=None, scale=None, *, bf16_matmul=False):
    """queries [B,L,H,E], keys [B,S,H,E], values [B,S,H,D],
    mask None or broadcastable to [B,H,L,S].  Returns [B,L,H,D]."""
    B, L, H, E = queries.shape
    _, S, _, D = values.shape
    scale = float(scale) if scale is not None else 1.0 / sqrt(E)
    BH = B * H

    # Head-major, lane-dense layout for the kernel (plain-JAX glue).
    q = jnp.transpose(queries, (0, 2, 1, 3)).reshape(BH, L, E)
    k = jnp.transpose(keys, (0, 2, 1, 3)).reshape(BH, S, E)
    v = jnp.transpose(values, (0, 2, 1, 3)).reshape(BH, S, D)

    # bf16 MXU operands are an opt-in (v6e/v7x): accumulation stays f32 either way.
    dot_dtype = jnp.bfloat16 if bf16_matmul else queries.dtype
    q_it = jnp.dtype(q.dtype).itemsize
    k_it = jnp.dtype(k.dtype).itemsize
    v_it = jnp.dtype(v.dtype).itemsize
    o_it = jnp.dtype(queries.dtype).itemsize
    dot_it = jnp.dtype(dot_dtype).itemsize

    vmem_limit, budget = _vmem_caps()

    # --- mask normalization: minimal stream bytes, no broadcast materialization ---
    m3 = None
    mode = "none"
    mL = mS = 1
    m_it = 0
    if mask is not None:
        m = jnp.asarray(mask)
        if m.ndim > 4:
            raise ValueError("mask rank must be <= 4")
        if m.dtype == jnp.bool_:
            m = m.astype(jnp.int8)                 # 1-byte stream; 0/1 exact
        elif jnp.dtype(m.dtype).itemsize > o_it:
            m = m.astype(queries.dtype)            # never stream wider than q
        m4 = m.reshape((1,) * (4 - m.ndim) + tuple(m.shape))
        mB, mH, mL, mS = m4.shape
        if not (mB in (1, B) and mH in (1, H) and mL in (1, L) and mS in (1, S)):
            raise ValueError("mask must be broadcastable to (B, H, L, S)")
        m3 = m4.reshape(mB * mH, mL, mS)           # free reshape (contiguous)
        m_it = jnp.dtype(m3.dtype).itemsize
        if mB * mH == 1:
            mode = "bcast"
        elif mB == B and mH == H:
            mode = "full"
        elif mH == 1:
            mode = "per_batch"                     # (B,1,L,S)
        else:
            mode = "per_head"                      # (1,H,L,S)
    need_div_H = mode in ("per_batch", "per_head")

    # Fully-broadcast masks stay VMEM-resident (single DMA) when they fit.
    mask_resident = (mode == "bcast"
                     and 2 * _tile_bytes(mL, mS, m_it) <= budget // 4)

    # --- honest working-set estimate (padded, double-buffered, with temporaries) ---
    def ws_bytes(g, lt, st):
        if m3 is None:
            mtb = 0
        elif mask_resident:
            mtb = _tile_bytes(mL, mS, m_it)                       # whole mask
        else:
            mlb = lt if mL == L else 1
            msb = st if mS == S else 1
            mtb = (g if mode in ("full", "per_head") else 1) * _tile_bytes(mlb, msb, m_it)
        buffered = g * (_tile_bytes(lt, E, q_it) + _tile_bytes(st, E, k_it)
                        + _tile_bytes(st, D, v_it) + _tile_bytes(lt, D, o_it)) + mtb
        scratch = g * (_tile_bytes(lt, E, dot_it)                 # pre-scaled q
                       + 2 * _tile_bytes(lt, 1, 4)                # running max / denom
                       + _tile_bytes(lt, D, 4))                   # f32 accumulator
        temps = 3 * g * _tile_bytes(lt, st, 4)                    # f32 score/prob temps
        return 2 * buffered + scratch + temps

    # Larger Lt first (K/V re-streamed L/Lt times per head group), then St.
    Lt = _pick_tile(L, (1024, 512, 256, 128))
    St = _pick_tile(S, (512, 256, 128))
    # Safety valve for very large shapes: shrink St before Lt while keeping
    # (8,128) alignment and divisibility.
    while ws_bytes(1, Lt, St) > budget:
        if St > 128 and St % 256 == 0:
            St //= 2
        elif Lt > 128 and Lt % 256 == 0:
            Lt //= 2
        elif Lt > 8 and Lt % 16 == 0:
            Lt //= 2
        else:
            break

    # --- heads per grid step: VMEM accounting is the only gate ---
    limit = H if need_div_H else BH
    G = 1
    for g in range(1, limit + 1):
        if limit % g == 0 and ws_bytes(g, Lt, St) <= budget:
            G = g
    # Megacore balance (v7x has 2 TensorCores): keep >= 2 parallel programs.
    if BH >= 2 and (BH // G) * (L // Lt) < 2:
        for g in range(G, 0, -1):
            if limit % g == 0 and BH // g >= 2:
                G = g
                break

    grid = (BH // G, L // Lt, S // St)

    in_specs = [
        pl.BlockSpec((G, Lt, E), lambda g, li, si: (g, li, 0)),
        pl.BlockSpec((G, St, E), lambda g, li, si: (g, si, 0)),
        pl.BlockSpec((G, St, D), lambda g, li, si: (g, si, 0)),
    ]
    inputs = [q, k, v]

    if m3 is not None:
        mask_slices = None
        if mask_resident:
            # Whole mask as one block with a constant index_map: DMA'd once,
            # stays VMEM-resident; sliced in-kernel with program_id offsets.
            in_specs.append(pl.BlockSpec((1, mL, mS), lambda g, li, si: (0, 0, 0)))
            mask_slices = (Lt if (mL == L and Lt != L) else None,
                           St if (mS == S and St != S) else None)
        else:
            blk0 = G if mode in ("full", "per_head") else 1
            blk1 = Lt if mL == L else 1
            blk2 = St if mS == S else 1

            def mask_idx(g, li, si, _mode=mode, _G=G, _H=H, _mL=mL, _mS=mS):
                if _mode == "bcast":
                    i0 = 0
                elif _mode == "full":
                    i0 = g
                elif _mode == "per_batch":
                    i0 = (g * _G) // _H            # group -> batch index (G | H)
                else:                              # per_head
                    i0 = g % (_H // _G)            # group -> head block (G | H)
                return (i0, li if _mL == L else 0, si if _mS == S else 0)

            in_specs.append(pl.BlockSpec((blk0, blk1, blk2), mask_idx))
        inputs.append(m3)
        kernel = functools.partial(_masked_attn_kernel, scale=scale,
                                   dot_dtype=dot_dtype, mask_slices=mask_slices)
    else:
        kernel = functools.partial(_attn_kernel, scale=scale, dot_dtype=dot_dtype)

    out_bh = pl.pallas_call(
        kernel,
        out_shape=jax.ShapeDtypeStruct((BH, L, D), queries.dtype),
        grid_spec=pltpu.PrefetchScalarGridSpec(
            num_scalar_prefetch=0,
            grid=grid,
            in_specs=in_specs,
            out_specs=pl.BlockSpec((G, Lt, D), lambda g, li, si: (g, li, 0)),
            scratch_shapes=[
                pltpu.VMEM((G, Lt, E), dot_dtype),     # pre-scaled q
                pltpu.VMEM((G, Lt, 1), jnp.float32),   # running max
                pltpu.VMEM((G, Lt, 1), jnp.float32),   # running denominator
                pltpu.VMEM((G, Lt, D), jnp.float32),   # running numerator
            ],
        ),
        compiler_params=pltpu.CompilerParams(
            dimension_semantics=("parallel", "parallel", "arbitrary"),
            vmem_limit_bytes=int(vmem_limit)),
    )(*inputs)

    # Back to the PyTorch output convention (B, L, H, D), contiguous.
    return jnp.transpose(out_bh.reshape(B, H, L, D), (0, 2, 1, 3))


# ----------------------------------------------------------------------------
# Pure-JAX reference (highest precision so TPU einsum defaults don't skew it)
# ----------------------------------------------------------------------------
def _reference(queries, keys, values, mask=None, scale=None):
    E = queries.shape[-1]
    scale = scale if scale is not None else 1.0 / sqrt(E)
    scores = jnp.einsum('blhe,bshe->bhls', queries, keys, precision="highest")
    A = jax.nn.softmax(scale * scores, axis=-1)
    if mask is not None:
        A = A * mask
    return jnp.einsum('bhls,bshd->blhd', A, values, precision="highest")


if __name__ == "__main__":
    # Small shapes consistent with the module's forward signature.
    B, L, S, H, E, D = 2, 8, 8, 4, 32, 32
    key = jax.random.PRNGKey(0)
    kq, kk, kv, km = jax.random.split(key, 4)

    queries = jax.random.normal(kq, (B, L, H, E), dtype=jnp.float32)
    keys_ = jax.random.normal(kk, (B, S, H, E), dtype=jnp.float32)
    values = jax.random.normal(kv, (B, S, H, D), dtype=jnp.float32)
    full_mask = (jax.random.uniform(km, (B, H, L, S)) > 0.2).astype(jnp.float32)
    # Zero an entire row to lock in mask-after-softmax semantics (row output -> 0).
    full_mask = full_mask.at[0, :, 0, :].set(0.0)

    def check(q_, k_, v_, mask, tag):
        out = mask_attention(q_, k_, v_, mask)
        jax.block_until_ready(out)
        ref = _reference(q_, k_, v_, mask)
        assert out.shape == ref.shape, f"{tag}: shape {out.shape} vs {ref.shape}"
        err = jnp.max(jnp.abs(out - ref))
        assert err < 2e-3, f"{tag}: max abs err {err}"

    check(queries, keys_, values, full_mask, "full mask (B,H,L,S)")
    check(queries, keys_, values, None, "no mask")
    check(queries, keys_, values, full_mask[:, :1], "per-batch mask (B,1,L,S)")
    check(queries, keys_, values, full_mask[:1, :1], "broadcast mask (1,1,L,S)")
    check(queries, keys_, values, full_mask > 0.5, "boolean mask (int8 stream)")

    # Larger shape: exercises L/S tiling, the multi-step online softmax and the
    # VMEM-resident broadcast mask with in-kernel slicing.
    B2, L2, S2, H2, E2, D2 = 1, 384, 384, 2, 32, 32
    kq2, kk2, kv2, km2 = jax.random.split(jax.random.PRNGKey(1), 4)
    q2 = jax.random.normal(kq2, (B2, L2, H2, E2), dtype=jnp.float32)
    k2 = jax.random.normal(kk2, (B2, S2, H2, E2), dtype=jnp.float32)
    v2 = jax.random.normal(kv2, (B2, S2, H2, D2), dtype=jnp.float32)
    m2 = (jax.random.uniform(km2, (1, 1, L2, S2)) > 0.3).astype(jnp.float32)
    check(q2, k2, v2, m2, "tiled broadcast mask, L=S=384")

    print("KERNEL_OK")
</pallas_src>

<mosaic_0001>
module attributes {stable_mosaic.version = 11 : i64} {
  func.func @_masked_attn_kernel(%arg0: i32, %arg1: i32, %arg2: i32, %arg3: memref<4x8x32xf32, #tpu.memory_space<vmem>>, %arg4: memref<4x8x32xf32, #tpu.memory_space<vmem>>, %arg5: memref<4x8x32xf32, #tpu.memory_space<vmem>>, %arg6: memref<4x8x8xf32, #tpu.memory_space<vmem>>, %arg7: memref<4x8x32xf32, #tpu.memory_space<vmem>>, %arg8: memref<4x8x32xf32, #tpu.memory_space<vmem>>, %arg9: memref<4x8x1xf32, #tpu.memory_space<vmem>>, %arg10: memref<4x8x1xf32, #tpu.memory_space<vmem>>, %arg11: memref<4x8x32xf32, #tpu.memory_space<vmem>>) attributes {dimension_semantics = [#tpu.dimension_semantics<parallel>, #tpu.dimension_semantics<parallel>, #tpu.dimension_semantics<arbitrary>], iteration_bounds = array<i64: 2, 1, 1>, scalar_prefetch = 0 : i64, scratch_operands = 4 : i64, tpu.core_type = #tpu.core_type<tc>, window_params = [{transform_indices = @transform_0, window_bounds = array<i64: 4, 8, 32>}, {transform_indices = @transform_1, window_bounds = array<i64: 4, 8, 32>}, {transform_indices = @transform_2, window_bounds = array<i64: 4, 8, 32>}, {transform_indices = @transform_3, window_bounds = array<i64: 4, 8, 8>}, {transform_indices = @transform_4, window_bounds = array<i64: 4, 8, 32>}]} {
    %c0_i32 = arith.constant 0 : i32
    %0 = arith.cmpi eq, %arg2, %c0_i32 : i32
    %1 = arith.extui %0 : i1 to i32
    %c0_i32_0 = arith.constant 0 : i32
    %2 = arith.cmpi ne, %1, %c0_i32_0 : i32
    scf.if %2 {
      %c0_35 = arith.constant 0 : index
      %c0_36 = arith.constant 0 : index
      %c0_37 = arith.constant 0 : index
      %34 = vector.load %arg3[%c0_35, %c0_36, %c0_37] : memref<4x8x32xf32, #tpu.memory_space<vmem>>, vector<4x8x32xf32>
      %cst_38 = arith.constant 0.176776692 : f32
      %35 = vector.broadcast %cst_38 : f32 to vector<4x8x32xf32>
      %36 = arith.mulf %34, %35 : vector<4x8x32xf32>
      %c0_39 = arith.constant 0 : index
      %c0_40 = arith.constant 0 : index
      %c0_41 = arith.constant 0 : index
      %37 = vector.load %arg8[%c0_39, %c0_40, %c0_41] : memref<4x8x32xf32, #tpu.memory_space<vmem>>, vector<4x8x32xf32>
      tpu.vector_store %arg8[%c0_39, %c0_40, %c0_41], %36 {strides = array<i32>} : memref<4x8x32xf32, #tpu.memory_space<vmem>>, vector<4x8x32xf32>,
      %cst_42 = arith.constant 0xFF800000 : f32
      %38 = vector.broadcast %cst_42 : f32 to vector<4x8x1xf32>
      %c0_43 = arith.constant 0 : index
      %c0_44 = arith.constant 0 : index
      %c0_45 = arith.constant 0 : index
      %39 = vector.load %arg9[%c0_43, %c0_44, %c0_45] : memref<4x8x1xf32, #tpu.memory_space<vmem>>, vector<4x8x1xf32>
      tpu.vector_store %arg9[%c0_43, %c0_44, %c0_45], %38 {strides = array<i32>} : memref<4x8x1xf32, #tpu.memory_space<vmem>>, vector<4x8x1xf32>,
      %cst_46 = arith.constant 0.000000e+00 : f32
      %40 = vector.broadcast %cst_46 : f32 to vector<4x8x1xf32>
      %c0_47 = arith.constant 0 : index
      %c0_48 = arith.constant 0 : index
      %c0_49 = arith.constant 0 : index
      %41 = vector.load %arg10[%c0_47, %c0_48, %c0_49] : memref<4x8x1xf32, #tpu.memory_space<vmem>>, vector<4x8x1xf32>
      tpu.vector_store %arg10[%c0_47, %c0_48, %c0_49], %40 {strides = array<i32>} : memref<4x8x1xf32, #tpu.memory_space<vmem>>, vector<4x8x1xf32>,
      %cst_50 = arith.constant 0.000000e+00 : f32
      %42 = vector.broadcast %cst_50 : f32 to vector<4x8x32xf32>
      %c0_51 = arith.constant 0 : index
      %c0_52 = arith.constant 0 : index
      %c0_53 = arith.constant 0 : index
      %43 = vector.load %arg11[%c0_51, %c0_52, %c0_53] : memref<4x8x32xf32, #tpu.memory_space<vmem>>, vector<4x8x32xf32>
      tpu.vector_store %arg11[%c0_51, %c0_52, %c0_53], %42 {strides = array<i32>} : memref<4x8x32xf32, #tpu.memory_space<vmem>>, vector<4x8x32xf32>,
    } else {
    }
    %c0 = arith.constant 0 : index
    %c0_1 = arith.constant 0 : index
    %c0_2 = arith.constant 0 : index
    %3 = vector.load %arg8[%c0, %c0_1, %c0_2] : memref<4x8x32xf32, #tpu.memory_space<vmem>>, vector<4x8x32xf32>
    %c0_3 = arith.constant 0 : index
    %c0_4 = arith.constant 0 : index
    %c0_5 = arith.constant 0 : index
    %4 = vector.load %arg4[%c0_3, %c0_4, %c0_5] : memref<4x8x32xf32, #tpu.memory_space<vmem>>, vector<4x8x32xf32>
    %c0_6 = arith.constant 0 : index
    %c0_7 = arith.constant 0 : index
    %c0_8 = arith.constant 0 : index
    %5 = vector.load %arg5[%c0_6, %c0_7, %c0_8] : memref<4x8x32xf32, #tpu.memory_space<vmem>>, vector<4x8x32xf32>
    %cst = arith.constant dense<0.000000e+00> : vector<4x8x8xf32>
    %6 = tpu.matmul %3, %4, %cst {dimension_numbers = #tpu.dot_dimension_numbers<[2], [2], [1], [1], [0, 0, 0, 1, 1, 1], [0], [0]>} : vector<4x8x32xf32>, vector<4x8x32xf32>, vector<4x8x8xf32> -> vector<4x8x8xf32>
    %c0_9 = arith.constant 0 : index
    %c0_10 = arith.constant 0 : index
    %c0_11 = arith.constant 0 : index
    %7 = vector.load %arg9[%c0_9, %c0_10, %c0_11] : memref<4x8x1xf32, #tpu.memory_space<vmem>>, vector<4x8x1xf32>
    %cst_12 = arith.constant dense<0xFF800000> : vector<4x8xf32>
    %8 = vector.multi_reduction <maximumf>, %6, %cst_12 [2] : vector<4x8x8xf32> to vector<4x8xf32>
    %9 = vector.shape_cast %8 : vector<4x8xf32> to vector<4x8x1xf32>
    %10 = arith.maximumf %7, %9 : vector<4x8x1xf32>
    %11 = arith.subf %7, %10 : vector<4x8x1xf32>
    %12 = math.exp %11 : vector<4x8x1xf32>
    %13 = vector.broadcast %10 : vector<4x8x1xf32> to vector<4x8x8xf32>
    %14 = arith.subf %6, %13 : vector<4x8x8xf32>
    %15 = math.exp %14 : vector<4x8x8xf32>
    %c0_13 = arith.constant 0 : index
    %c0_14 = arith.constant 0 : index
    %c0_15 = arith.constant 0 : index
    %16 = vector.load %arg10[%c0_13, %c0_14, %c0_15] : memref<4x8x1xf32, #tpu.memory_space<vmem>>, vector<4x8x1xf32>
    %17 = arith.mulf %12, %16 : vector<4x8x1xf32>
    %cst_16 = arith.constant dense<0.000000e+00> : vector<4x8xf32>
    %18 = vector.multi_reduction <add>, %15, %cst_16 [2] : vector<4x8x8xf32> to vector<4x8xf32>
    %19 = vector.shape_cast %18 : vector<4x8xf32> to vector<4x8x1xf32>
    %20 = arith.addf %17, %19 : vector<4x8x1xf32>
    %c0_17 = arith.constant 0 : index
    %c0_18 = arith.constant 0 : index
    %c0_19 = arith.constant 0 : index
    %21 = vector.load %arg10[%c0_17, %c0_18, %c0_19] : memref<4x8x1xf32, #tpu.memory_space<vmem>>, vector<4x8x1xf32>
    tpu.vector_store %arg10[%c0_17, %c0_18, %c0_19], %20 {strides = array<i32>} : memref<4x8x1xf32, #tpu.memory_space<vmem>>, vector<4x8x1xf32>,
    %c0_20 = arith.constant 0 : index
    %c0_21 = arith.constant 0 : index
    %c0_22 = arith.constant 0 : index
    %22 = vector.load %arg6[%c0_20, %c0_21, %c0_22] : memref<4x8x8xf32, #tpu.memory_space<vmem>>, vector<4x8x8xf32>
    %23 = arith.mulf %15, %22 : vector<4x8x8xf32>
    %cst_23 = arith.constant dense<0.000000e+00> : vector<4x8x32xf32>
    %24 = tpu.matmul %23, %5, %cst_23 {dimension_numbers = #tpu.dot_dimension_numbers<[2], [1], [1], [2], [0, 0, 0, 1, 1, 2], [0], [0]>} : vector<4x8x8xf32>, vector<4x8x32xf32>, vector<4x8x32xf32> -> vector<4x8x32xf32>
    %c0_24 = arith.constant 0 : index
    %c0_25 = arith.constant 0 : index
    %c0_26 = arith.constant 0 : index
    %25 = vector.load %arg11[%c0_24, %c0_25, %c0_26] : memref<4x8x32xf32, #tpu.memory_space<vmem>>, vector<4x8x32xf32>
    %26 = vector.broadcast %12 : vector<4x8x1xf32> to vector<4x8x32xf32>
    %27 = arith.mulf %26, %25 : vector<4x8x32xf32>
    %28 = arith.addf %27, %24 : vector<4x8x32xf32>
    %c0_27 = arith.constant 0 : index
    %c0_28 = arith.constant 0 : index
    %c0_29 = arith.constant 0 : index
    %29 = vector.load %arg11[%c0_27, %c0_28, %c0_29] : memref<4x8x32xf32, #tpu.memory_space<vmem>>, vector<4x8x32xf32>
    tpu.vector_store %arg11[%c0_27, %c0_28, %c0_29], %28 {strides = array<i32>} : memref<4x8x32xf32, #tpu.memory_space<vmem>>, vector<4x8x32xf32>,
    %c0_30 = arith.constant 0 : index
    %c0_31 = arith.constant 0 : index
    %c0_32 = arith.constant 0 : index
    %30 = vector.load %arg9[%c0_30, %c0_31, %c0_32] : memref<4x8x1xf32, #tpu.memory_space<vmem>>, vector<4x8x1xf32>
    tpu.vector_store %arg9[%c0_30, %c0_31, %c0_32], %10 {strides = array<i32>} : memref<4x8x1xf32, #tpu.memory_space<vmem>>, vector<4x8x1xf32>,
    %c0_i32_33 = arith.constant 0 : i32
    %31 = arith.cmpi eq, %arg2, %c0_i32_33 : i32
    %32 = arith.extui %31 : i1 to i32
    %c0_i32_34 = arith.constant 0 : i32
    %33 = arith.cmpi ne, %32, %c0_i32_34 : i32
    scf.if %33 {
      %c0_35 = arith.constant 0 : index
      %c0_36 = arith.constant 0 : index
      %c0_37 = arith.constant 0 : index
      %34 = vector.load %arg10[%c0_35, %c0_36, %c0_37] : memref<4x8x1xf32, #tpu.memory_space<vmem>>, vector<4x8x1xf32>
      %35 = tpu.reciprocal %34 : vector<4x8x1xf32> -> vector<4x8x1xf32>
      %c0_38 = arith.constant 0 : index
      %c0_39 = arith.constant 0 : index
      %c0_40 = arith.constant 0 : index
      %36 = vector.load %arg11[%c0_38, %c0_39, %c0_40] : memref<4x8x32xf32, #tpu.memory_space<vmem>>, vector<4x8x32xf32>
      %37 = vector.broadcast %35 : vector<4x8x1xf32> to vector<4x8x32xf32>
      %38 = arith.mulf %36, %37 : vector<4x8x32xf32>
      %c0_41 = arith.constant 0 : index
      %c0_42 = arith.constant 0 : index
      %c0_43 = arith.constant 0 : index
      %39 = vector.load %arg7[%c0_41, %c0_42, %c0_43] : memref<4x8x32xf32, #tpu.memory_space<vmem>>, vector<4x8x32xf32>
      tpu.vector_store %arg7[%c0_41, %c0_42, %c0_43], %38 {strides = array<i32>} : memref<4x8x32xf32, #tpu.memory_space<vmem>>, vector<4x8x32xf32>,
    } else {
    }
    return
  }
  func.func @transform_0(%arg0: i32, %arg1: i32, %arg2: i32) -> (i32, i32, i32) {
    %c0_i32 = arith.constant 0 : i32
    %c0_i32_0 = arith.constant 0 : i32
    return %arg0, %arg1, %c0_i32 : i32, i32, i32
  }
  func.func @transform_1(%arg0: i32, %arg1: i32, %arg2: i32) -> (i32, i32, i32) {
    %c0_i32 = arith.constant 0 : i32
    %c0_i32_0 = arith.constant 0 : i32
    return %arg0, %arg2, %c0_i32 : i32, i32, i32
  }
  func.func @transform_2(%arg0: i32, %arg1: i32, %arg2: i32) -> (i32, i32, i32) {
    %c0_i32 = arith.constant 0 : i32
    %c0_i32_0 = arith.constant 0 : i32
    return %arg0, %arg2, %c0_i32 : i32, i32, i32
  }
  func.func @transform_3(%arg0: i32, %arg1: i32, %arg2: i32) -> (i32, i32, i32) {
    %c0_i32 = arith.constant 0 : i32
    return %arg0, %arg1, %arg2 : i32, i32, i32
  }
  func.func @transform_4(%arg0: i32, %arg1: i32, %arg2: i32) -> (i32, i32, i32) {
    %c0_i32 = arith.constant 0 : i32
    %c0_i32_0 = arith.constant 0 : i32
    return %arg0, %arg1, %c0_i32 : i32, i32, i32
  }
}

</mosaic_0001>

<bundles_post_ra>
// kernel: tpu_custom_call.1
= control target key start
LH: loop header
LB: loop body
LE: loop exit
PB: predicated region body
PF: predicated region fallthrough
CT: control target
= control target key end

     0   :  { %s1744_s0 = inlined_call_operand.hbm [shape: f32[8,8,32], index: 0, kind: input, shape index: {}]   ;;  %s1745_s1 = inlined_call_operand.hbm [shape: f32[8,8,32], index: 1, kind: input, shape index: {}]   ;;  %s1746_s2 = inlined_call_operand.hbm [shape: f32[8,8,32], index: 2, kind: input, shape index: {}]   ;;  %s1747_s3 = inlined_call_operand.hbm [shape: f32[8,8,8], index: 3, kind: input, shape index: {}]   ;;  %s1748_s4 = inlined_call_operand.hbm [shape: f32[8,8,32], index: 4, kind: output, shape index: {}]  }
   0x1   :  { %1754 = sst [smem:[#allocation24_spill]] %s1744_s0 }
   0x2   :  { %1755 = sst [smem:[#allocation25_spill]] %s1745_s1 }
   0x3   :  { %9 = vsyncpa [#allocation7], 0 }
   0x4   :  { %11 = vsyncpa [#allocation7 + $0x1], 0 }
   0x5   :  { %12 = vsyncpa [#allocation10], 0 }
   0x6   :  { %14 = vsyncpa [#allocation10 + $0x1], 0 }
   0x7   :  { %15 = vsyncpa [#allocation13], 0 }
   0x8   :  { %17 = vsyncpa [#allocation13 + $0x1], 0 }
   0x9   :  { %18 = vsyncpa [#allocation8], 0 }
   0xa   :  { %20 = vsyncpa [#allocation8 + $0x1], 0  ;;  %s1435_s15 = smov 0   ;;  %s1437_s16 = smov 0  }
   0xb   :  { %s1439_s17 = smov 0   ;;  %s1441_s18 = smov 0  }
   0xc   :  { %s1443_s19 = smov 0   ;;  %s1445_s20 = smov 0  }
   0xd LB: > { %1756 = sst [smem:[#allocation19_spill]] %s1389_s17  ;;  %s1466_s21 = sadd.s32 4294967295, %s1401_s20   ;;  %s1401_s20 = sphi %s1445_s20, %s26_s20   ;;  %s1397_s19 = sphi %s1443_s19, %s1773_s19   ;;  %s1393_s18 = sphi %s1441_s18, %s1772_s18   ;;  %s1389_s17 = sphi %s1439_s17, %s1771_s17   ;;  %s1385_s16 = sphi %s1437_s16, %s1775_s16   ;;  %s1381_s15 = sphi %s1435_s15, %s1774_s15  }
   0xe   : > { %1757 = sst [smem:[#allocation20_spill]] %s1397_s19  ;;  %s1037_s22 = sadd.s32 4294967294, %s1401_s20  }
   0xf   : > { %1758 = sst [smem:[#allocation21_spill]] %s1401_s20  ;;  %s45_s23 = sadd.s32 1, %s1397_s19 }
  0x10   : > { %s54_s24 = sadd.s32 1, %s1389_s17  ;;  %p47_p0 = scmp.ge.s32.totalorder %s45_s23, 2 }
  0x11   : > { %p61_p1 = scmp.ne.s32.totalorder %s1389_s17, %s1385_s16  ;;  %p62_p2 = scmp.eq.s32.totalorder %s1401_s20, 0 }
  0x12   : > { %p67_p3 = scmp.ne.s32.totalorder %s1385_s16, %s1381_s15  ;;  %s1777_s23 = smov (%p47_p0, %s45_s23), 0 }
  0x13   : > { %1759 = sst [smem:[#allocation22_spill]] %s1777_s23  ;;  %p1478_p4 = por %p62_p2, %p61_p1 }
  0x14   : > { %p68_p5 = scmp.eq.s32.totalorder %s1466_s21, 0  ;;  %s49_s26 = ssub.s32 %s1397_s19, %s1777_s23 }
  0x15   : > { %p179_p6 = scmp.eq.s32.totalorder %s1466_s21, 1  ;;  %p52_p7 = scmp.eq.s32.totalorder %s49_s26, 0 }
  0x16   : > { %p1486_p8 = por %p68_p5, %p67_p3  ;;  %p185_p10 = scmp.eq.s32.totalorder %s1037_s22, 1 }
  0x17   : > { %p1490_p9 = por %p179_p6, %p61_p1  ;;  %p1039_p12 = scmp.ge.s32.totalorder %s1401_s20, 2 }
  0x18   : > { %s1495_s29 = scalar_select %p52_p7, %s1389_s17, %s54_s24  }
  0x19   : > { %p1497_p11 = por %p185_p10, %p67_p3  ;;  %p1107_p13 = scmp.lt.s32.totalorder %s1401_s20, 2 }
  0x1a   : > { %1763 = sst [smem:[#allocation23_spill]] %s1495_s29  ;;  %s1504_s5 = sand.u32 1, %s1389_s17  }
  0x1b   : > { %s1507_s6 = sshll.u32 %s1504_s5, 5  ;;  %s1510_s7 = sshll.u32 %s1397_s19, 5 }
  0x1c   : > { %p1514_p0 = pnand %p1107_p13, %p1478_p4  ;;  %s228_s9 = sand.u32 1, %s1401_s20  }
  0x1d   : > { %s1766_s1 = sld [smem:[#allocation25_spill]]  ;;  %s232_s14 = scalar_lea.vmem [#allocation9], %s1507_s6 }
  0x1e   : > { %s241_s22 = sshll.u32 %s232_s14, 4  ;;  %s229_s24 = scalar_lea.sflag [#allocation10], %s228_s9  ;;  %s242_s22 = int_to_ptr.vmem [resolvable:$true] %s241_s22 }
  0x1f   : > { %s1403_s25 = smov 128   ;;  %s1404_s26 = smov 8  }
  0x20   : > { %p1052_p1 = scmp.ge.s32.totalorder %s1401_s20, 1  ;;  %p296_p2 = scmp.lt.s32.totalorder %s1401_s20, 3 }
  0x21   : > { %s1768_s0 = sld [smem:[#allocation24_spill]]  ;;  %s261_s11 = scalar_lea.hbm %s1746_s2, %s1510_s7 }
  0x22   : > { %p1531_p3 = pnand %p1052_p1, %p296_p2  ;;  %s285_s17 = scalar_lea.hbm %s1747_s3, %s1510_s7 }
  0x23   : > { %s238_s12 = scalar_lea.hbm %s1766_s1, %s1510_s7  ;;  %s209_s1 = scalar_lea.vmem [#allocation6], %s1507_s6 }
  0x24   : > { %s239_s13 = sshll.u32 %s238_s12, 4  ;;  %s218_s23 = sshll.u32 %s209_s1, 4  ;;  %s240_s13 = int_to_ptr.hbm [resolvable:$true] %s239_s13  ;;  %s219_s23 = int_to_ptr.vmem [resolvable:$true] %s218_s23 }
  0x25   : > { %1096 = dma.hbm_to_vmem [thread:$0]  (!%p1514_p0), %s240_s13, 512, %s242_s22, %s229_s24, %s1403_s25, %s1403_s25, %s1404_s26  }
  0x26   : > { %s206_s13 = scalar_lea.sflag [#allocation7], %s1504_s5  ;;  %s262_s12 = sshll.u32 %s261_s11, 4  ;;  %s263_s12 = int_to_ptr.hbm [resolvable:$true] %s262_s12 }
  0x27   : > { %s215_s9 = scalar_lea.hbm %s1768_s0, %s1510_s7  ;;  %s255_s0 = scalar_lea.vmem [#allocation11], %s1507_s6 }
  0x28   : > { %s216_s14 = sshll.u32 %s215_s9, 4  ;;  %s264_s29 = sshll.u32 %s255_s0, 4  ;;  %s217_s14 = int_to_ptr.hbm [resolvable:$true] %s216_s14  ;;  %s265_s29 = int_to_ptr.vmem [resolvable:$true] %s264_s29 }
  0x29   : > { %1093 = dma.hbm_to_vmem [thread:$0]  (!%p1514_p0), %s217_s14, 512, %s219_s23, %s206_s13, %s1403_s25, %s1403_s25, %s1404_s26  }
  0x2a   : > { %1099 = dma.hbm_to_vmem [thread:$0]  (!%p1514_p0), %s263_s12, 512, %s265_s29, %s229_s24, %s1403_s25, %s1403_s25, %s1404_s26  }
  0x2b   : > { %s278_s20 = scalar_lea.vmem [#allocation12], %s1507_s6  ;;  %s286_s14 = sshll.u32 %s285_s17, 4  ;;  %s287_s14 = int_to_ptr.hbm [resolvable:$true] %s286_s14 }
  0x2c   : > { %s288_s23 = sshll.u32 %s278_s20, 4  ;;  %s275_s19 = scalar_lea.sflag [#allocation13], %s1504_s5  ;;  %s289_s23 = int_to_ptr.vmem [resolvable:$true] %s288_s23 }
  0x2d   : > { %1102 = dma.hbm_to_vmem [thread:$0]  (!%p1514_p0), %s287_s14, 512, %s289_s23, %s275_s19, %s1403_s25, %s1403_s25, %s1404_s26  }
  0x2e   : > { %300 = sbr.rel (%p1531_p3) target bundleno = 706 (0x2c2), region = 36  ;;  %s1570_s0 = sand.u32 (!%p1531_p3), 1, %s1385_s16  }
  0x2f   : > { %s1573_s29 = sshll.u32 (!%p1531_p3), %s1570_s0, 5  ;;  %s303_s17 = scalar_lea.sflag (!%p1531_p3), [#allocation7], %s1570_s0 }
  0x30   : > { %s306_s20 = scalar_lea.vmem (!%p1531_p3), [#allocation6], %s1573_s29 }
  0x33   : > { %1364 = dma.done.wait (%p1486_p8), %s303_s17, 512  }
  0x34   : > { %1366 = vsyncadd (%p1486_p8), %s303_s17, 4294966784  ;;  %s312_s5 = sand.u32 1, %s1466_s21   ;;  %s316_s7 = scalar_lea.vmem [#allocation9], %s1573_s29 }
  0x35   : > { %s313_s6 = scalar_lea.sflag [#allocation10], %s312_s5 }
  0x36   : > { %1368 = dma.done.wait (%p1486_p8), %s313_s6, 1024  }
  0x37   : > { %1370 = vsyncadd (%p1486_p8), %s313_s6, 4294966272  ;;  %s1588_s8 = scalar_lea.vmem [#allocation11], %s1573_s29  ;;  %s333_s24 = scalar_lea.sflag [#allocation13], %s1570_s0 }
  0x38   : > { %s1592_s25 = scalar_lea.vmem [#allocation12], %s1573_s29 }
  0x39   : > { %1372 = dma.done.wait (%p1486_p8), %s333_s24, 512  }
  0x3a   : > { %1374 = vsyncadd (%p1486_p8), %s333_s24, 4294966784  ;;  %vm394_vm0 = vcmask 261120   ;;  %v416_v0 = vld [vmem:[%s316_s7] sm:$0xff]  ;;  %v418_v1 = vld [vmem:[%s316_s7 + $0x10] sm:$0xff]  ;;  %vm399_vm1 = vcmask 7168   ;;  %v1405_v16 = vmov -inf  }
  0x3b   : > { %v386_v2 = vld [vmem:[%s306_s20] sm:$0xff]  ;;  %1058 = vmatpush.xpose.msk.msra.mxu0 %vm394_vm0, %v416_v0  ;;  %1062 = vmatpush.xpose.msk.msra.mxu2 %vm394_vm0, %v418_v1  ;;  %v388_v4 = vld [vmem:[%s306_s20 + $0x10] sm:$0xff]  ;;  %v417_v5 = vld [vmem:[%s316_s7 + $0x8] sm:$0xff]  ;;  %400 = vst.msk [vmem:[#allocation3] sm:$0xff] %vm399_vm1, %v1405_v16  ;;  %vm533_vm2 = vcmask 64512   ;;  %v1406_v25 = vmov 0  }
  0x3c   : > { %v390_v3 = vmul.f32 0.17677669, %v386_v2  ;;  %v419_v6 = vld [vmem:[%s316_s7 + $0x18] sm:$0xff]  ;;  %v392_v7 = vmul.f32 0.17677669, %v388_v4  ;;  %1060 = vmatpush.xpose.msk.msra.mxu1 %vm394_vm0, %v417_v5  ;;  %v387_v8 = vld [vmem:[%s306_s20 + $0x8] sm:$0xff]  ;;  %1165 = vset.pattern.permute.xlu0 %v1406_v25 }
  0x3d   : > { %1064 = vmatpush.xpose.msk.msra.mxu3 %vm394_vm0, %v419_v6  ;;  %v389_v9 = vld [vmem:[%s306_s20 + $0x18] sm:$0xff]  ;;  %v391_v10 = vmul.f32 0.17677669, %v387_v8  ;;  %401 = vst.msk [vmem:[#allocation3 + $0x8] sm:$0xff] %vm399_vm1, %v1405_v16  ;;  %1164 = vset.pattern.permute.xlu2 %v1406_v25  ;;  %v1407_v26 = vmov 0.0   ;;  %v422_v43 = vld [vmem:[%s1588_s8 + $0x10] sm:$0xff] }
  0x3e   : > { %395 = vst.msk [vmem:[#allocation2] sm:$0xff] %vm394_vm0, %v390_v3  ;;  %v393_v11 = vmul.f32 0.17677669, %v389_v9  ;;  %1166 = vset.pattern.permute.xlu1 %v1406_v25  ;;  %v423_v44 = vld [vmem:[%s1588_s8 + $0x18] sm:$0xff]  ;;  %v420_v45 = vld [vmem:[%s1588_s8] sm:$0xff]  ;;  %v421_v46 = vld [vmem:[%s1588_s8 + $0x8] sm:$0xff] }
  0x3f   : > { %397 = vst.msk [vmem:[#allocation2 + $0x10] sm:$0xff] %vm394_vm0, %v392_v7  ;;  %695 = vmatpush.msrb.mxu2 %v422_v43  ;;  %649 = vmatpush.msrb.mxu0 %v420_v45  ;;  %v625_v52 = vld [vmem:[%s1592_s25 + $0x10] sm:$0xff]  ;;  %v626_v58 = vld [vmem:[%s1592_s25 + $0x18] sm:$0xff]  ;;  %v623_v1 = vld [vmem:[%s1592_s25] sm:$0xff]  ;;  %s376_s21 = scalar_lea.vmem [#allocation14], %s1573_s29  ;;  %s1079_s27 = sshll.u32 %s1393_s18, 5 }
  0x40   : > { %396 = vst.msk [vmem:[#allocation2 + $0x8] sm:$0xff] %vm394_vm0, %v391_v10  ;;  %672 = vmatpush.msrb.mxu1 %v421_v46  ;;  %v624_v6 = vld [vmem:[%s1592_s25 + $0x8] sm:$0xff]  ;;  %s871_s13 = scalar_lea.hbm %s1748_s4, %s1079_s27  ;;  %s872_s22 = sshll.u32 %s376_s21, 4  ;;  %s873_s22 = int_to_ptr.vmem [resolvable:$true] %s872_s22 }
  0x41   : > { %398 = vst.msk [vmem:[#allocation2 + $0x18] sm:$0xff] %vm394_vm0, %v393_v11  ;;  %718 = vmatpush.msrb.mxu3 %v423_v44  ;;  %s874_s11 = sshll.u32 %s871_s13, 4  ;;  %s859_s18 = scalar_lea.sflag [#allocation8], %s1570_s0  ;;  %s875_s11 = int_to_ptr.hbm [resolvable:$true] %s874_s11 }
  0x42   : > { %402 = vst.msk [vmem:[#allocation3 + $0x10] sm:$0xff] %vm399_vm1, %v1405_v16  ;;  %v1632_v27 = vld [vmem:[#allocation3] sm:$0xff]  ;;  %s1325_s12 = sshra.s32 %s875_s11, 4  ;;  %s1331_s14 = scalar_lea.hbm %s1748_s4, 64  ;;  %s1326_s12 = int_to_ptr.hbm [resolvable:$true] %s1325_s12 }
  0x43   : > { %403 = vst.msk [vmem:[#allocation3 + $0x18] sm:$0xff] %vm399_vm1, %v1405_v16  ;;  %s1327_s1 = scalar_lea.hbm %s1326_s12, 32  ;;  %p1332_p7 = scmp.lt.s32.totalorder %s1326_s12, %s1748_s4 }
  0x44   : > { %406 = vst.msk [vmem:[#allocation4 + $0x10] sm:$0xff] %vm399_vm1, %v1407_v26  ;;  %v1644_v32 = vld [vmem:[#allocation3 + $0x8] sm:$0xff]  ;;  %p1328_p4 = scmp.ne.s32.totalorder %s1326_s12, %s1327_s1  ;;  %p1333_p8 = scmp.lt.s32.totalorder %s1331_s14, %s1327_s1 }
  0x45   : > { %v412_v12 = vld [vmem:[#allocation2] sm:$0xff]  ;;  %404 = vst.msk [vmem:[#allocation4] sm:$0xff] %vm399_vm1, %v1407_v26 }
  0x46   : > { %1059 = vmatmul.msk.f32.vlgmr.msra.gmra.mxu0 %vm394_vm0, %v412_v12  ;;  %v414_v13 = vld [vmem:[#allocation2 + $0x10] sm:$0xff]  ;;  %405 = vst.msk [vmem:[#allocation4 + $0x8] sm:$0xff] %vm399_vm1, %v1407_v26  ;;  %p1329_p5 = pnand %p1328_p4, %p1490_p9  ;;  %p1334_p10 = por %p1333_p8, %p1332_p7 }
  0x47   : > { %1063 = vmatmul.msk.f32.vlgmr.msra.gmra.mxu2 %vm394_vm0, %v414_v13  ;;  %v413_v14 = vld [vmem:[#allocation2 + $0x8] sm:$0xff]  ;;  %407 = vst.msk [vmem:[#allocation4 + $0x18] sm:$0xff] %vm399_vm1, %v1407_v26 }
  0x48   : > { %1061 = vmatmul.msk.f32.vlgmr.msra.gmra.mxu1 %vm394_vm0, %v413_v14  ;;  %v415_v15 = vld [vmem:[#allocation2 + $0x18] sm:$0xff]  ;;  %408 = vst.msk [vmem:[#allocation5] sm:$0xff] %vm394_vm0, %v1407_v26  ;;  %p1330_p6 = pneg %p1329_p5 }
  0x49   : > { %1065 = vmatmul.msk.f32.vlgmr.msra.gmra.mxu3 %vm394_vm0, %v415_v15  ;;  %409 = vst.msk [vmem:[#allocation5 + $0x8] sm:$0xff] %vm394_vm0, %v1407_v26  ;;  %v1642_v31 = vld [vmem:[#allocation3 + $0x10] sm:$0xff] }
  0x4a   : > { %410 = vst.msk [vmem:[#allocation5 + $0x10] sm:$0xff] %vm394_vm0, %v1407_v26  ;;  %v1657_v39 = vld [vmem:[#allocation3 + $0x18] sm:$0xff]  ;;  %p1335_p13 = pnand %p1334_p10, %p1330_p6 }
  0x4b   : > { %411 = vst.msk [vmem:[#allocation5 + $0x18] sm:$0xff] %vm394_vm0, %v1407_v26 }
  0xc3   : > { %v1614_v17 = vpop.f32.mrf.mxu0 }
  0xc4   : > { %v534_v18 = vsel %vm533_vm2, %v1614_v17, -inf }
  0xc5   : > { %535 = vmax.xlane.f32.xlu1 %v534_v18  ;;  %v1618_v19 = vpop.f32.mrf.mxu1 }
  0xc6   : > { %v537_v21 = vsel %vm533_vm2, %v1618_v19, -inf }
  0xca   : > { %v500_v20 = vpop.f32.mrf.mxu2 }
  0xcb   : > { %v540_v22 = vsel %vm533_vm2, %v500_v20, -inf }
  0xcc   : > { %541 = vmax.xlane.f32.xlu0 %v540_v22  ;;  %v526_v23 = vpop.f32.mrf.mxu3 }
  0xcd   : > { %538 = vmax.xlane.f32.xlu1 %v537_v21  ;;  %v543_v24 = vsel %vm533_vm2, %v526_v23, -inf }
  0xd4   : > { %544 = vmax.xlane.f32.xlu0 %v543_v24  ;;  %v594_v24 = vld [vmem:[#allocation4] sm:$0xff] }
 0x138   : > { %v536_v28 = vpop.xlane.xlu1 %535 }
 0x139   : > { %v1635_v29 = vmax.f32 %v1632_v27, %v536_v28 }
 0x13b   : > { %v550_v30 = vsub.f32 %v1632_v27, %v1635_v29  ;;  %759 = vst.msk [vmem:[#allocation3] sm:$0xff] %vm399_vm1, %v1635_v29  ;;  %564 = vperm.xlu0 %1165, %v1635_v29  }
 0x13d   : > { %v554_v11 = vmul.f32 1.442695, %v550_v30 }
 0x13f   : > { %v542_v33 = vpop.xlane.xlu0 %541 }
 0x140   : > { %v1647_v34 = vmax.f32 %v1642_v31, %v542_v33  ;;  %v539_v35 = vpop.xlane.xlu1 %538  ;;  %v595_v33 = vld [vmem:[#allocation4 + $0x8] sm:$0xff] }
 0x141   : > { %v547_v36 = vmax.f32 %v1644_v32, %v539_v35 }
 0x142   : > { %v552_v37 = vsub.f32 %v1642_v31, %v1647_v34  ;;  %761 = vst.msk [vmem:[#allocation3 + $0x10] sm:$0xff] %vm399_vm1, %v1647_v34  ;;  %574 = vperm.xlu2 %1164, %v1647_v34   ;;  %v597_v31 = vld [vmem:[#allocation4 + $0x18] sm:$0xff] }
 0x143   : > { %v551_v38 = vsub.f32 %v1644_v32, %v547_v36  ;;  %760 = vst.msk [vmem:[#allocation3 + $0x8] sm:$0xff] %vm399_vm1, %v547_v36  ;;  %569 = vperm.xlu1 %1166, %v547_v36  }
 0x144   : > { %v558_v13 = vmul.f32 1.442695, %v552_v37 }
 0x145   : > { %v556_v12 = vmul.f32 1.442695, %v551_v38 }
 0x147   : > { %v545_v40 = vpop.xlane.xlu0 %544 }
 0x148   : > { %v549_v41 = vmax.f32 %v1657_v39, %v545_v40 }
 0x14a   : > { %v553_v42 = vsub.f32 %v1657_v39, %v549_v41  ;;  %762 = vst.msk [vmem:[#allocation3 + $0x18] sm:$0xff] %vm399_vm1, %v549_v41  ;;  %579 = vperm.xlu2 %1164, %v549_v41  }
 0x14c   : > { %v560_v16 = vmul.f32 1.442695, %v553_v42 }
 0x19c   : > { %v575_v47 = vpop.permute.xlu2 %574 }
 0x19d   : > { %v584_v48 = vsub.f32 %v500_v20, %v575_v47  ;;  %v723_v47 = vld [vmem:[#allocation5] sm:$0xff] }
 0x19f   : > { %v590_v49 = vmul.f32 1.442695, %v584_v48 }
 0x1a1   : > { %1167 = vpow2.f32 %v590_v49 }
 0x1a4   : > { %v580_v50 = vpop.permute.xlu2 %579 }
 0x1a5   : > { %v585_v51 = vsub.f32 %v526_v23, %v580_v50 }
 0x1a7   : > { %v1168_v53 = vpop.eup %1167  ;;  %v592_v54 = vmul.f32 1.442695, %v585_v51 }
 0x1a8   : > { %v608_v55 = vsel %vm533_vm2, %v1168_v53, 0.0  ;;  %v629_v56 = vmul.f32 %v1168_v53, %v625_v52 }
 0x1a9   : > { %1169 = vpow2.f32 %v592_v54  ;;  %609 = vadd.xlane.f32.xlu0 %v608_v55 }
 0x1aa   : > { %1068 = vmatmul.msk.f32.vlgmr.msrb.gmra.mxu2 %vm533_vm2, %v629_v56 }
 0x1ad   : > { %v565_v57 = vpop.permute.xlu0 %564 }
 0x1ae   : > { %v582_v59 = vsub.f32 %v1614_v17, %v565_v57 }
 0x1af   : > { %v1170_v60 = vpop.eup %1169 }
 0x1b0   : > { %v586_v61 = vmul.f32 1.442695, %v582_v59  ;;  %v630_v62 = vmul.f32 %v1170_v60, %v626_v58  ;;  %v611_v8 = vsel %vm533_vm2, %v1170_v60, 0.0  ;;  %v725_v58 = vld [vmem:[#allocation5 + $0x10] sm:$0xff] }
 0x1b2   : > { %1171 = vpow2.f32 %v586_v61  ;;  %1069 = vmatmul.msk.f32.vlgmr.msrb.gmra.mxu3 %vm533_vm2, %v630_v62 }
 0x1b5   : > { %v570_v63 = vpop.permute.xlu1 %569 }
 0x1b6   : > { %v583_v0 = vsub.f32 %v1618_v19, %v570_v63  ;;  %v596_v19 = vld [vmem:[#allocation4 + $0x10] sm:$0xff] }
 0x1b8   : > { %v1172_v2 = vpop.eup %1171  ;;  %v588_v3 = vmul.f32 1.442695, %v583_v0 }
 0x1b9   : > { %v602_v4 = vsel %vm533_vm2, %v1172_v2, 0.0  ;;  %v627_v5 = vmul.f32 %v1172_v2, %v623_v1 }
 0x1ba   : > { %1173 = vpow2.f32 %v588_v3  ;;  %603 = vadd.xlane.f32.xlu2 %v602_v4 }
 0x1bb   : > { %1066 = vmatmul.msk.f32.vlgmr.msrb.gmra.mxu0 %vm533_vm2, %v627_v5  ;;  %1175 = vpow2.f32 %v554_v11  ;;  %v726_v11 = vld [vmem:[#allocation5 + $0x18] sm:$0xff] }
 0x1bc   : > { %1177 = vpow2.f32 %v556_v12  ;;  %v724_v12 = vld [vmem:[#allocation5 + $0x8] sm:$0xff] }
 0x1bd   : > { %1179 = vpow2.f32 %v558_v13 }
 0x1be   : > { %1181 = vpow2.f32 %v560_v16 }
 0x1c0   : > { %v1174_v7 = vpop.eup %1173 }
 0x1c1   : > { %v605_v9 = vsel %vm533_vm2, %v1174_v7, 0.0  ;;  %v628_v10 = vmul.f32 %v1174_v7, %v624_v6  ;;  %v1176_v14 = vpop.eup %1175 }
 0x1c2   : > { %612 = vadd.xlane.f32.xlu2 %v611_v8  ;;  %606 = vadd.xlane.f32.xlu1 %v605_v9  ;;  %v1178_v15 = vpop.eup %1177  ;;  %v598_v25 = vmul.f32 %v1176_v14, %v594_v24 }
 0x1c3   : > { %1067 = vmatmul.msk.f32.vlgmr.msrb.gmra.mxu1 %vm533_vm2, %v628_v10  ;;  %v1180_v17 = vpop.eup %1179  ;;  %v599_v39 = vmul.f32 %v1178_v15, %v595_v33 }
 0x1c4   : > { %v1182_v18 = vpop.eup %1181  ;;  %v600_v20 = vmul.f32 %v1180_v17, %v596_v19 }
 0x1c5   : > { %v601_v36 = vmul.f32 %v1182_v18, %v597_v31 }
 0x1da   : > { %729 = vperm.xlu2 %1164, %v1176_v14  }
 0x1db   : > { %734 = vperm.xlu1 %1166, %v1178_v15  }
 0x1e2   : > { %739 = vperm.xlu2 %1164, %v1180_v17  }
 0x1ea   : > { %744 = vperm.xlu2 %1164, %v1182_v18  }
 0x21c   : > { %v610_v21 = vpop.xlane.xlu0 %609 }
 0x21d   : > { %v616_v22 = vadd.f32 %v610_v21, %v600_v20 }
 0x21f   : > { %621 = vst.msk [vmem:[#allocation4 + $0x10] sm:$0xff] %vm399_vm1, %v616_v22 }
 0x226   : > { %v768_v23 = vld [vmem:[#allocation4 + $0x10] sm:$0xff] }
 0x227   : > { %1183 = vrcp.f32 %v768_v23  ;;  %v809_v32 = vand.u32 2147483648, %v768_v23  ;;  %v807_v35 = vand.u32 2147483647, %v768_v23  ;;  %vm803_vm4 = vweird.f32 %v768_v23 }
 0x229   : > { %v810_v40 = vor.u32 1.1754944e-38, %v809_v32  ;;  %vm808_vm6 = vcmp.eq.f32.partialorder %v807_v35, 8.507059e+37 }
 0x22d   : > { %v1184_v26 = vpop.eup %1183  ;;  %v604_v27 = vpop.xlane.xlu2 %603 }
 0x22e   : > { %v614_v28 = vadd.f32 %v604_v27, %v598_v25  ;;  %v799_v29 = vmul.f32 %v1184_v26, %v768_v23  ;;  %vm804_vm3 = vweird.f32 %v1184_v26  ;;  %v697_v3 = vpop.f32.mrf.mxu2 }
 0x22f   : > { %vm805_vm5 = vmor %vm803_vm4, %vm804_vm3 }
 0x230   : > { %619 = vst.msk [vmem:[#allocation4] sm:$0xff] %vm399_vm1, %v614_v28  ;;  %v800_v30 = vsub.f32 1.0, %v799_v29 }
 0x232   : > { %v801_v34 = vmul.f32 %v1184_v26, %v800_v30 }
 0x234   : > { %v802_v37 = vadd.f32 %v1184_v26, %v801_v34 }
 0x235   : > { %v613_v38 = vpop.xlane.xlu2 %612  ;;  %v607_v42 = vpop.xlane.xlu1 %606 }
 0x236   : > { %v617_v41 = vadd.f32 %v613_v38, %v601_v36  ;;  %v806_v43 = vsel %vm805_vm5, %v1184_v26, %v802_v37  ;;  %v615_v44 = vadd.f32 %v607_v42, %v599_v39  ;;  %v720_v22 = vpop.f32.mrf.mxu3 }
 0x237   : > { %v811_v45 = vsel %vm808_vm6, %v810_v40, %v806_v43  ;;  %v766_v46 = vld [vmem:[#allocation4] sm:$0xff] }
 0x238   : > { %622 = vst.msk [vmem:[#allocation4 + $0x18] sm:$0xff] %vm399_vm1, %v617_v41  ;;  %842 = vperm.xlu1 %1166, %v811_v45   ;;  %1185 = vrcp.f32 %v766_v46  ;;  %v651_v51 = vpop.f32.mrf.mxu0  ;;  %v781_v57 = vand.u32 2147483648, %v766_v46  ;;  %v779_v60 = vand.u32 2147483647, %v766_v46  ;;  %vm775_vm8 = vweird.f32 %v766_v46 }
 0x239   : > { %620 = vst.msk [vmem:[#allocation4 + $0x8] sm:$0xff] %vm399_vm1, %v615_v44 }
 0x23a   : > { %v782_v1 = vor.u32 1.1754944e-38, %v781_v57  ;;  %vm780_vm10 = vcmp.eq.f32.partialorder %v779_v60, 8.507059e+37 }
 0x23d   : > { %v730_v48 = vpop.permute.xlu2 %729 }
 0x23e   : > { %v1186_v49 = vpop.eup %1185  ;;  %v747_v50 = vmul.f32 %v730_v48, %v723_v47 }
 0x23f   : > { %v771_v52 = vmul.f32 %v1186_v49, %v766_v46  ;;  %v1690_v53 = vld [vmem:[#allocation4 + $0x18] sm:$0xff]  ;;  %vm776_vm7 = vweird.f32 %v1186_v49 }
 0x240   : > { %v751_v54 = vadd.f32 %v747_v50, %v651_v51  ;;  %v767_v55 = vld [vmem:[#allocation4 + $0x8] sm:$0xff]  ;;  %1187 = vrcp.f32 %v1690_v53  ;;  %vm777_vm9 = vmor %vm775_vm8, %vm776_vm7  ;;  %v674_v23 = vpop.f32.mrf.mxu1  ;;  %v823_v30 = vand.u32 2147483648, %v1690_v53  ;;  %vm817_vm1 = vweird.f32 %v1690_v53 }
 0x241   : > { %v772_v56 = vsub.f32 1.0, %v771_v52  ;;  %1189 = vrcp.f32 %v767_v55  ;;  %v795_v13 = vand.u32 2147483648, %v767_v55  ;;  %v793_v15 = vand.u32 2147483647, %v767_v55 }
 0x242   : > { %755 = vst.msk [vmem:[#allocation5] sm:$0xff] %vm394_vm0, %v751_v54  ;;  %vm789_vm12 = vweird.f32 %v767_v55  ;;  %v821_v31 = vand.u32 2147483647, %v1690_v53  ;;  %v824_v33 = vor.u32 1.1754944e-38, %v823_v30 }
 0x243   : > { %v773_v59 = vmul.f32 %v1186_v49, %v772_v56  ;;  %v796_v24 = vor.u32 1.1754944e-38, %v795_v13  ;;  %vm794_vm14 = vcmp.eq.f32.partialorder %v793_v15, 8.507059e+37 }
 0x244   : > { %vm822_vm3 = vcmp.eq.f32.partialorder %v821_v31, 8.507059e+37 }
 0x245   : > { %v740_v61 = vpop.permute.xlu2 %739  ;;  %v774_v62 = vadd.f32 %v1186_v49, %v773_v59 }
 0x246   : > { %v1188_v63 = vpop.eup %1187  ;;  %v749_v0 = vmul.f32 %v740_v61, %v725_v58 }
 0x247   : > { %v1190_v2 = vpop.eup %1189  ;;  %v778_v4 = vsel %vm777_vm9, %v1186_v49, %v774_v62  ;;  %v813_v5 = vmul.f32 %v1188_v63, %v1690_v53  ;;  %vm818_vm15 = vweird.f32 %v1188_v63 }
 0x248   : > { %v753_v6 = vadd.f32 %v749_v0, %v697_v3  ;;  %v783_v7 = vsel %vm780_vm10, %v782_v1, %v778_v4  ;;  %v785_v8 = vmul.f32 %v1190_v2, %v767_v55  ;;  %vm790_vm11 = vweird.f32 %v1190_v2  ;;  %vm819_vm2 = vmor %vm817_vm1, %vm818_vm15 }
 0x249   : > { %832 = vperm.xlu0 %1165, %v783_v7   ;;  %v814_v10 = vsub.f32 1.0, %v813_v5  ;;  %vm791_vm13 = vmor %vm789_vm12, %vm790_vm11  ;;  %v826_v44 = vld [vmem:[#allocation5] sm:$0xff] }
 0x24a   : > { %757 = vst.msk [vmem:[#allocation5 + $0x10] sm:$0xff] %vm394_vm0, %v753_v6  ;;  %v786_v9 = vsub.f32 1.0, %v785_v8 }
 0x24b   : > { %v815_v21 = vmul.f32 %v1188_v63, %v814_v10 }
 0x24c   : > { %v787_v14 = vmul.f32 %v1190_v2, %v786_v9 }
 0x24d   : > { %v745_v16 = vpop.permute.xlu2 %744  ;;  %v735_v17 = vpop.permute.xlu1 %734  ;;  %v816_v29 = vadd.f32 %v1188_v63, %v815_v21 }
 0x24e   : > { %v750_v18 = vmul.f32 %v745_v16, %v726_v11  ;;  %v748_v19 = vmul.f32 %v735_v17, %v724_v12  ;;  %v788_v20 = vadd.f32 %v1190_v2, %v787_v14 }
 0x24f   : > { %v820_v32 = vsel %vm819_vm2, %v1188_v63, %v816_v29 }
 0x250   : > { %v754_v25 = vadd.f32 %v750_v18, %v720_v22  ;;  %v752_v26 = vadd.f32 %v748_v19, %v674_v23  ;;  %v792_v27 = vsel %vm791_vm13, %v1190_v2, %v788_v20  ;;  %v825_v34 = vsel %vm822_vm3, %v824_v33, %v820_v32 }
 0x251   : > { %v797_v28 = vsel %vm794_vm14, %v796_v24, %v792_v27  ;;  %v828_v35 = vld [vmem:[#allocation5 + $0x10] sm:$0xff] }
 0x252   : > { %758 = vst.msk [vmem:[#allocation5 + $0x18] sm:$0xff] %vm394_vm0, %v754_v25  ;;  %837 = vperm.xlu2 %1164, %v797_v28  }
 0x253   : > { %756 = vst.msk [vmem:[#allocation5 + $0x8] sm:$0xff] %vm394_vm0, %v752_v26 }
 0x259   : > { %v829_v41 = vld [vmem:[#allocation5 + $0x18] sm:$0xff] }
 0x25a   : > { %847 = vperm.xlu2 %1164, %v825_v34   ;;  %v827_v38 = vld [vmem:[#allocation5 + $0x8] sm:$0xff] }
 0x2aa   : > { %v843_v36 = vpop.permute.xlu1 %842 }
 0x2ab   : > { %v852_v37 = vmul.f32 %v843_v36, %v828_v35 }
 0x2ac   : > { %v838_v39 = vpop.permute.xlu2 %837 }
 0x2ad   : > { %856 = vst.msk [vmem:[%s376_s21 + $0x10] sm:$0xff] %vm394_vm0, %v852_v37  ;;  %v851_v40 = vmul.f32 %v838_v39, %v827_v38 }
 0x2af   : > { %855 = vst.msk [vmem:[%s376_s21 + $0x8] sm:$0xff] %vm394_vm0, %v851_v40 }
 0x2b4   : > { %v848_v42 = vpop.permute.xlu2 %847 }
 0x2b5   : > { %v853_v43 = vmul.f32 %v848_v42, %v829_v41 }
 0x2b7   : > { %857 = vst.msk [vmem:[%s376_s21 + $0x18] sm:$0xff] %vm394_vm0, %v853_v43 }
 0x2bb   : > { %v833_v45 = vpop.permute.xlu0 %832 }
 0x2bc   : > { %v850_v46 = vmul.f32 %v833_v45, %v826_v44 }
 0x2be   : > { %854 = vst.msk [vmem:[%s376_s21] sm:$0xff] %vm394_vm0, %v850_v46 }
 0x2bf   : > { %1338 = shalt.err (!%p1335_p13)
}
 0x2c0   : > { %s1408_s0 = smov 128   ;;  %s1409_s17 = smov 8  }
 0x2c1   : > { %1088 = dma.vmem_to_hbm [thread:$0]  (%p1490_p9), %s873_s22, 512, %s875_s11, %s859_s18, %s1408_s0, %s1408_s0, %s1409_s17  }
 0x2c2 PF: > { %s1769_s20 = sld [smem:[#allocation21_spill]]  ;;  %s889_s5 = sand.u32 1, %s1381_s15  }
 0x2c3   : > { %p1104_p0 = pnand %p1039_p12, %p1497_p11  ;;  %s890_s6 = scalar_lea.sflag [#allocation8], %s889_s5 }
 0x2c5   : > { %p1105_p1 = pneg %p1104_p0 }
 0x2c7   : > { %1376 = dma.done.wait (%p1105_p1), %s890_s6, 512  }
 0x2c8   : > { %1378 = vsyncadd (%p1105_p1), %s890_s6, 4294966784  ;;  %s26_s20 = sadd.s32 1, %s1769_s20   ;;  %s1770_s7 = sld [smem:[#allocation19_spill]] }
 0x2c9   : > { %p23_p2 = scmp.ge.s32.totalorder %s26_s20, 4   ;;  %s1771_s17 = sld [smem:[#allocation23_spill]] }
 0x2ca   : > { %s1772_s18 = sld [smem:[#allocation20_spill]]  ;;  %s1774_s15 = smov %s1385_s16 }
 0x2cb   : > { %s1773_s19 = sld [smem:[#allocation22_spill]]  ;;  %25 = sbr.rel (!%p23_p2) target bundleno = 13 (0xd), region = 126 }
 0x2ce   : > { %s1775_s16 = smov %s1770_s7 }
 0x2d0   :  { %896 = vsyncpa [#allocation7], 1 }
 0x2d1   :  { %898 = vsyncpa [#allocation7 + $0x1], 1 }
 0x2d2   :  { %899 = vsyncpa [#allocation10], 1 }
 0x2d3   :  { %901 = vsyncpa [#allocation10 + $0x1], 1 }
 0x2d4   :  { %902 = vsyncpa [#allocation13], 1 }
 0x2d5   :  { %904 = vsyncpa [#allocation13 + $0x1], 1 }
 0x2d6   :  { %905 = vsyncpa [#allocation8], 1 }
 0x2d7   :  { %907 = vsyncpa [#allocation8 + $0x1], 1 }

</bundles_post_ra>
